<compile_context>
chip_gen: v5e
topology: v5e:2x2
jax: 0.10.0
libtpu: 0.0.40
codegen_flags: <defaults>
</compile_context>

<pallas_src>
import jax
import jax.numpy as jnp
from jax.experimental import pallas as pl
from jax.experimental.pallas import tpu as pltpu


def _round_up(n, m):
    return ((n + m - 1) // m) * m


def _cdiv(n, m):
    return (n + m - 1) // m


def _upsample_kernel(x_ref, e_ref, b_ref, o_ref):
    # x_ref: (tm, tk) VMEM (input dtype)      e_ref: (tk, tk*U) VMEM (resident)
    # b_ref: (1,) SMEM f32                    o_ref: (tm, tk*U) VMEM (input dtype)
    acc = jnp.dot(x_ref[...], e_ref[...], preferred_element_type=jnp.float32)
    o_ref[...] = (acc + b_ref[0]).astype(o_ref.dtype)


def upsampling_forward(x, weight, bias, upsampling_factor, *, tm_target=1024):
    """Pallas equivalent of UpSampling.forward.

    Args:
      x: (B, C, T) array (any float dtype; output has the same dtype).
      weight: ConvTranspose2d weight of shape (1, 1, 1, U) or (U,).
      bias: (1,) bias.
      upsampling_factor: int U.

    Returns:
      (B, C, T * U) array in x.dtype.
    """
    B, C, T = x.shape
    U = int(upsampling_factor)
    R = B * C
    dtype = x.dtype
    isz = jnp.dtype(dtype).itemsize

    w = jnp.asarray(weight, dtype).reshape(U)
    b = jnp.asarray(bias, jnp.float32).reshape(1)

    x2 = x.reshape(R, T)

    # Pick the time-block width tk.  After folding time into rows the arrays
    # are (rows, tk) / (rows, tk*U), so block dims equal the full array dims
    # and the (8, 128) constraint is always satisfied.  tk = 128 gives
    # lane-aligned input loads and lane-dense (>=128) output stores.
    if T % 128 == 0:
        tk, T_pad = 128, T
    elif T <= 128:
        tk, T_pad = T, T                        # tiny T: no padding at all
    else:
        tk, T_pad = 128, _round_up(T, 128)      # fallback: pad time, slice later
        x2 = jnp.pad(x2, ((0, 0), (0, T_pad - T)))

    # Fold time blocks into the row axis (free, contiguous reshape).
    rows = R * (T_pad // tk)
    xf = x2.reshape(rows, tk)
    out_cols = tk * U

    # Row-tile size: large (low per-step overhead), sublane aligned.
    tm = max(8, min(tm_target, _round_up(rows, 8)) // 8 * 8)
    if rows >= 64:
        # Keep >= ~4 row tiles so the pipeline has depth and both v7x cores work.
        tm = min(tm, max(8, _round_up(_cdiv(rows, 4), 8)))
    # Cap the double-buffered (x + out) tile footprint at ~24 MiB (v7x-safe).
    per_row_bytes = 2 * tk * isz + 2 * out_cols * isz
    tm = min(tm, max(8, ((24 << 20) // per_row_bytes) // 8 * 8))

    # Shared block-diagonal expansion tile: E[t, t*U + k] = w[k]  (exact even
    # in low precision, since entries are copies of w or zero).
    E = jnp.kron(jnp.eye(tk, dtype=dtype), w.reshape(1, U))

    grid = (_cdiv(rows, tm),)

    # VMEM footprint: double-buffered x/out tiles + the (double-buffered) E.
    vmem_bytes = 2 * tm * tk * isz + 2 * tm * out_cols * isz + 2 * tk * out_cols * isz
    vmem_limit = (
        int(min(2 * vmem_bytes + (2 << 20), 60 << 20)) if vmem_bytes > (12 << 20) else None
    )

    # Honest cost: this op is HBM-store-bound; the kron matmul FLOPs are fake.
    cost = pl.CostEstimate(
        flops=2 * rows * tk * U,   # one mul + one add per output element
        transcendentals=0,
        bytes_accessed=(rows * tk + rows * out_cols + tk * out_cols) * isz,
    )

    out = pl.pallas_call(
        _upsample_kernel,
        out_shape=jax.ShapeDtypeStruct((rows, out_cols), dtype),
        grid_spec=pl.GridSpec(
            grid=grid,
            in_specs=[
                # Moving x tile.
                pl.BlockSpec((tm, tk), lambda i: (i, 0)),
                # Expansion tile: same block every step -> stays resident in VMEM.
                pl.BlockSpec((tk, out_cols), lambda i: (0, 0)),
                # Bias scalar in SMEM (no padded VMEM tile).
                pl.BlockSpec(memory_space=pltpu.MemorySpace.SMEM),
            ],
            out_specs=pl.BlockSpec((tm, out_cols), lambda i: (i, 0)),
        ),
        compiler_params=pltpu.CompilerParams(
            dimension_semantics=("parallel",),
            vmem_limit_bytes=vmem_limit,
        ),
        cost_estimate=cost,
    )(xf, E, b)

    # Free inverse reshape (each tk block maps to a contiguous tk*U output run).
    out = out.reshape(R, T_pad * U)
    if T_pad != T:
        # Only on the padded fallback path (materializes a copy of the output).
        out = out[:, : T * U]
    return out.reshape(B, C, T * U)


def _reference(x, weight, bias, U):
    """Pure-JAX reference in f32 using the same (dtype-cast) weights as the kernel."""
    B, C, T = x.shape
    xf = x.astype(jnp.float32)
    wf = jnp.asarray(weight, x.dtype).astype(jnp.float32).reshape(U)
    bf = jnp.asarray(bias, jnp.float32).reshape(())
    return (xf[..., :, None] * wf).reshape(B, C, T * U) + bf


if __name__ == "__main__":
    key = jax.random.PRNGKey(0)

    def make_inputs(key, B, C, T, U, dtype):
        kx, kw, kb = jax.random.split(key, 3)
        x = jax.random.normal(kx, (B, C, T), dtype=jnp.float32).astype(dtype)
        # ConvTranspose2d(1, 1, (1, U), (1, U)) params: weight (1,1,1,U), bias (1,)
        w = jax.random.normal(kw, (U,), dtype=jnp.float32).astype(dtype)
        b = jax.random.normal(kb, (1,), dtype=jnp.float32)
        return x, w, b

    cases = [
        # (B, C, T, U, dtype, tm_target, atol/rtol)
        (2, 4, 16, 4, jnp.float32, 1024, 1e-5),    # small path (tk = T, no padding)
        (2, 2, 256, 4, jnp.bfloat16, 1024, 3e-2),  # fast path (tk = 128), bf16 end-to-end
        (3, 5, 200, 3, jnp.float32, 8, 1e-5),      # padded-T fallback + ragged row tiles
    ]

    for idx, (B, C, T, U, dtype, tm_target, tol) in enumerate(cases):
        key, sub = jax.random.split(key)
        x, w, b = make_inputs(sub, B, C, T, U, dtype)

        out = upsampling_forward(x, w, b, U, tm_target=tm_target)
        out = jax.block_until_ready(out)

        assert out.shape == (B, C, T * U), (idx, out.shape)
        assert out.dtype == x.dtype, (idx, out.dtype)

        ref = _reference(x, w, b, U)
        err = float(jnp.max(jnp.abs(out.astype(jnp.float32) - ref)))
        assert jnp.allclose(out.astype(jnp.float32), ref, atol=tol, rtol=tol), (idx, err)

    print("KERNEL_OK")
</pallas_src>

<mosaic_0001>
module attributes {stable_mosaic.version = 11 : i64} {
  func.func @_upsample_kernel(%arg0: i32, %arg1: memref<8x16xf32, #tpu.memory_space<vmem>>, %arg2: memref<16x64xf32, #tpu.memory_space<vmem>>, %arg3: memref<1xf32, #tpu.memory_space<smem>>, %arg4: memref<8x64xf32, #tpu.memory_space<vmem>>) attributes {dimension_semantics = [#tpu.dimension_semantics<parallel>], iteration_bounds = array<i64: 1>, scalar_prefetch = 0 : i64, scratch_operands = 0 : i64, tpu.core_type = #tpu.core_type<tc>, window_params = [{transform_indices = @transform_0, window_bounds = array<i64: 8, 16>}, {pipeline_mode = #tpu.pipeline_mode<synchronous>, transform_indices = @transform_1, window_bounds = array<i64: 16, 64>}, {transform_indices = @transform_2, window_bounds = array<i64: 1>}, {transform_indices = @transform_3, window_bounds = array<i64: 8, 64>}]} {
    %c0 = arith.constant 0 : index
    %c0_0 = arith.constant 0 : index
    %0 = vector.load %arg1[%c0, %c0_0] : memref<8x16xf32, #tpu.memory_space<vmem>>, vector<8x16xf32>
    %c0_1 = arith.constant 0 : index
    %c0_2 = arith.constant 0 : index
    %1 = vector.load %arg2[%c0_1, %c0_2] : memref<16x64xf32, #tpu.memory_space<vmem>>, vector<16x64xf32>
    %cst = arith.constant dense<0.000000e+00> : vector<8x64xf32>
    %2 = tpu.matmul %0, %1, %cst {dimension_numbers = #tpu.dot_dimension_numbers<[1], [0], [0], [1], [0, 0, 1, 1], [], []>} : vector<8x16xf32>, vector<16x64xf32>, vector<8x64xf32> -> vector<8x64xf32>
    %c0_3 = arith.constant 0 : index
    %3 = memref.load %arg3[%c0_3] : memref<1xf32, #tpu.memory_space<smem>>
    %4 = vector.broadcast %3 : f32 to vector<8x64xf32>
    %5 = arith.addf %2, %4 : vector<8x64xf32>
    %c0_4 = arith.constant 0 : index
    %c0_5 = arith.constant 0 : index
    %6 = vector.load %arg4[%c0_4, %c0_5] : memref<8x64xf32, #tpu.memory_space<vmem>>, vector<8x64xf32>
    tpu.vector_store %arg4[%c0_4, %c0_5], %5 {strides = array<i32>} : memref<8x64xf32, #tpu.memory_space<vmem>>, vector<8x64xf32>,
    return
  }
  func.func @transform_0(%arg0: i32) -> (i32, i32) {
    %c0_i32 = arith.constant 0 : i32
    %c0_i32_0 = arith.constant 0 : i32
    return %arg0, %c0_i32 : i32, i32
  }
  func.func @transform_1(%arg0: i32) -> (i32, i32) {
    %c0_i32 = arith.constant 0 : i32
    %c0_i32_0 = arith.constant 0 : i32
    %c0_i32_1 = arith.constant 0 : i32
    return %c0_i32, %c0_i32_0 : i32, i32
  }
  func.func @transform_2(%arg0: i32) -> i32 {
    %c0_i32 = arith.constant 0 : i32
    %c0_i32_0 = arith.constant 0 : i32
    return %c0_i32 : i32
  }
  func.func @transform_3(%arg0: i32) -> (i32, i32) {
    %c0_i32 = arith.constant 0 : i32
    %c0_i32_0 = arith.constant 0 : i32
    return %arg0, %c0_i32 : i32, i32
  }
}

</mosaic_0001>

<bundles_post_ra>
// kernel: tpu_custom_call.1
= control target key start
LH: loop header
LB: loop body
LE: loop exit
PB: predicated region body
PF: predicated region fallthrough
CT: control target
= control target key end

     0   :  { %9 = vsyncpa [#allocation4], 0  ;;  %s216_s0 = inlined_call_operand.hbm [shape: f32[8,16], index: 0, kind: input, shape index: {}]   ;;  %s217_s1 = inlined_call_operand.hbm [shape: f32[16,64], index: 1, kind: input, shape index: {}]   ;;  %s218_s2 = inlined_call_operand.<no memory space> [shape: f32[1], index: 2, kind: input, shape index: {}]   ;;  %s219_s3 = inlined_call_operand.hbm [shape: f32[8,64], index: 3, kind: output, shape index: {}]  }
   0x1   :  { %10 = vsyncpa [#allocation7], 0 }
   0x2   :  { %11 = vsyncpa [#allocation5], 0  ;;  %s17_s14 = sshll.u32 %s216_s0, 4  ;;  %s179_s15 = smov [#allocation3]   ;;  %s18_s14 = int_to_ptr.hbm [resolvable:$true] %s17_s14 }
   0x3   :  { %s19_s16 = sshll.u32 %s179_s15, 4  ;;  %s27_s19 = sshll.u32 %s217_s1, 4  ;;  %s20_s16 = int_to_ptr.vmem [resolvable:$true] %s19_s16  ;;  %s28_s19 = int_to_ptr.hbm [resolvable:$true] %s27_s19 }
   0x4   :  { %22 = dma.hbm_to_vmem [thread:$0]  %s18_s14, 128, %s20_s16, [#allocation4]  }
   0x5   :  { %s180_s20 = smov [#allocation6]   ;;  %s181_s22 = smov 128  }
   0x6   :  { %s29_s21 = sshll.u32 %s180_s20, 4  ;;  %s182_s23 = smov 8   ;;  %s30_s21 = int_to_ptr.vmem [resolvable:$true] %s29_s21 }
   0x7   :  { %35 = dma.hbm_to_vmem [thread:$0]  %s28_s19, 256, %s30_s21, [#allocation7], %s181_s22, %s181_s22, %s182_s23  }
   0x8   :  { %173 = dma.done.wait [#allocation4], 128  }
   0x9   :  { %174 = vsyncadd [#allocation4], 4294967168 }
   0xa   :  { %175 = dma.done.wait [#allocation7], 256  }
   0xb   :  { %176 = vsyncadd [#allocation7], 4294967040  ;;  %v48_v0 = vld [vmem:[#allocation6 + $0x8] sm:$0xff]  ;;  %v47_v1 = vld [vmem:[#allocation6] sm:$0xff]  ;;  %vm51_vm0 = vcmask 130048   ;;  %v50_v3 = vstv %s218_s2  ;;  %s183_s24 = smov [#allocation8]  }
   0xc   :  { %69 = vmatpush.msra.mxu0 %v48_v0  ;;  %v46_v2 = vld [vmem:[#allocation3] sm:$0xff]  ;;  %s82_s25 = sshll.u32 %s183_s24, 4  ;;  %s84_s28 = sshll.u32 %s219_s3, 4  ;;  %vm75_vm1 = vcmask 523264   ;;  %s83_s25 = int_to_ptr.vmem [resolvable:$true] %s82_s25  ;;  %s85_s28 = int_to_ptr.hbm [resolvable:$true] %s84_s28 }
   0xe   :  { %70 = vmatpush.msra.mxu0 %v47_v1 }
   0xf   :  { %95 = vmatmul.msk.f32.vlgmr.msra.gmra.mxu0 %vm51_vm0, %v46_v2 }
  0x8c   :  { %v72_v4 = vpop.f32.mrf.mxu0 }
  0x8d   :  { %v73_v5 = vadd.f32 %v72_v4, %v50_v3 }
  0x8f   :  { %76 = vst.msk [vmem:[#allocation8] sm:$0xff] %vm75_vm1, %v73_v5 }
  0x90   :  { %87 = dma.vmem_to_hbm [thread:$0]  %s83_s25, 128, %s85_s28, [#allocation5]  }
  0x91   :  { %177 = dma.done.wait [#allocation5], 128  }
  0x92   :  { %178 = vsyncadd [#allocation5], 4294967168 }
  0x93   :  { %92 = vsyncpa [#allocation4], 1 }
  0x94   :  { %93 = vsyncpa [#allocation7], 1 }
  0x95   :  { %94 = vsyncpa [#allocation5], 1 }

</bundles_post_ra>
